<compile_context>
chip_gen: v6e
topology: v6e:2x2x1
jax: 0.10.0
libtpu: 0.0.40
codegen_flags: <defaults>
</compile_context>

<pallas_src>
import functools

import jax
import jax.numpy as jnp
from jax import lax
from jax.experimental import pallas as pl
from jax.experimental.pallas import tpu as pltpu


def _round_up(x, m):
    return ((x + m - 1) // m) * m


def _focal_pow(w, gamma):
    """w**gamma. Integer gamma -> VPU multiplies (handles negative bases like
    torch.pow); otherwise jnp.power (NaN for negative base, same as torch)."""
    g = float(gamma)
    if g.is_integer() and g >= 0:
        n = int(g)
        if n == 0:
            return jnp.ones_like(w)
        result = None
        base = w
        while n > 0:
            if n & 1:
                result = base if result is None else result * base
            n >>= 1
            if n > 0:
                base = base * base
        return result
    return jnp.power(w, g)


def _focal_loss_kernel(x_ref, t_ref, a_ref, loss_ref, *, gamma, n_valid, tile_n):
    i = pl.program_id(0)

    x = x_ref[...]                       # (tn, C), native dtype (f32 / bf16 / ...)
    t = t_ref[...]                       # (tn, 1), int32
    alpha = a_ref[...]                   # (1, C), f32, VMEM-resident

    tn, C = x.shape

    # Target-class mask as bool -- no float one-hot materialized.
    col_ids = lax.broadcasted_iota(jnp.int32, (tn, C), 1)
    mask = col_ids == t                                               # (tn, C)

    # log_p[n] = x[n, t[n]]: exactly one nonzero per row; do the lane reduction
    # on the otherwise-idle MXU instead of the 2-XLU budget.
    xf = jnp.where(mask, x.astype(jnp.float32), 0.0)                  # (tn, C) f32
    ones_col = jnp.ones((C, 1), jnp.float32)
    log_p = jnp.dot(xf, ones_col,
                    preferred_element_type=jnp.float32,
                    precision=lax.Precision.HIGHEST)                  # (tn, 1)

    # alpha[t[n]]: one XLU lane-reduce against the resident alpha row.
    # (Could also ride the MXU via dot(mask_f32, alpha_col) if XLU ever binds.)
    alpha_sel = jnp.sum(jnp.where(mask, alpha, 0.0), axis=1, keepdims=True)

    probs = jnp.exp(log_p)                                            # EUP
    w = _focal_pow(1.0 - probs, gamma)                                # VPU
    loss = -alpha_sel * w * log_p                                     # (tn, 1)

    # Ragged last block: *select* (not multiply) so NaN/Inf computed from the
    # unspecified out-of-bounds rows cannot leak into anything.
    row_ids = lax.broadcasted_iota(jnp.int32, (tn, 1), 0) + i * tile_n
    loss_ref[...] = jnp.where(row_ids < n_valid, loss, 0.0)


def _pick_tile_n(N, C, itemsize, sub, vmem_cap, target_tile_bytes=4 << 20):
    """Biggest legal batch tile: ~target bytes of logits per step, capped by the
    double-buffered VMEM footprint (lane-padded rows) within ~75% of VMEM."""
    row_hbm = C * itemsize + 4                                 # bytes DMA'd per row
    # VMEM per row: lane-padded logits row + (tn,1) int32 targets row (~512 B)
    # + (tn,1) f32 loss row (~512 B).
    row_vmem = _round_up(C, 128) * itemsize + 512 + 512
    tile_budget = max((vmem_cap * 3) // 4, 8 << 20)            # ~48 MiB v7x, ~96 MiB v5e/v6e
    tn = max(target_tile_bytes // row_hbm, sub)
    tn = min(tn, max(tile_budget // (2 * row_vmem), sub))
    tn = max(sub, (tn // sub) * sub)
    if tn >= N:
        return int(N)          # a single block equal to the full batch is always legal
    return int(tn)


def focal_loss(inputs, targets, alpha, *, gamma=5.0, size_average=True,
               tile_n=None):
    """inputs: (N, C); targets: (N,) int; alpha: (C,) or (C,1) -> scalar f32."""
    x = jnp.asarray(inputs)
    N, C = x.shape
    t = jnp.asarray(targets).reshape(N, 1).astype(jnp.int32)
    a = jnp.asarray(alpha).reshape(1, C).astype(jnp.float32)

    itemsize = x.dtype.itemsize
    sub = 8 * max(1, 4 // max(itemsize, 1))     # f32 -> 8, bf16 -> 16, 8-bit -> 32

    try:
        vmem_cap = int(pltpu.get_tpu_info().vmem_capacity_bytes)
    except Exception:
        vmem_cap = 64 << 20                      # conservative fallback (v7x per-core)

    if tile_n is None:
        tn = _pick_tile_n(N, C, itemsize, sub, vmem_cap)
    else:
        tn = max(sub, (int(tile_n) // sub) * sub)
        if tn >= N:
            tn = int(N)
    num_tiles = -(-N // tn)

    # VMEM limit sized from the real (lane-padded) double-buffered footprint.
    row_vmem = _round_up(C, 128) * itemsize + 512 + 512
    alpha_vmem = 2 * 8 * _round_up(C, 128) * 4
    vmem_limit = int(min(vmem_cap,
                         max(2 * tn * row_vmem + alpha_vmem + (2 << 20), 16 << 20)))

    kernel = functools.partial(_focal_loss_kernel, gamma=float(gamma),
                               n_valid=int(N), tile_n=int(tn))

    per_row = pl.pallas_call(
        kernel,
        out_shape=jax.ShapeDtypeStruct((N, 1), jnp.float32),
        grid=(num_tiles,),
        in_specs=[
            pl.BlockSpec((tn, C), lambda i: (i, 0)),   # logits tile, native dtype
            pl.BlockSpec((tn, 1), lambda i: (i, 0)),   # targets tile
            pl.BlockSpec((1, C), lambda i: (0, 0)),    # alpha row, VMEM-resident
        ],
        out_specs=pl.BlockSpec((tn, 1), lambda i: (i, 0)),
        compiler_params=pltpu.CompilerParams(
            dimension_semantics=("parallel",),          # batch tiles are independent
            vmem_limit_bytes=vmem_limit,
        ),
    )(x, t, a)

    total = jnp.sum(per_row)
    if size_average:
        total = total / jnp.float32(N)
    return total


def focal_loss_ref(inputs, targets, alpha, *, gamma=5.0, size_average=True):
    """Pure-JAX reference mirroring the PyTorch forward."""
    x = jnp.asarray(inputs).astype(jnp.float32)
    N, C = x.shape
    tgt = jnp.asarray(targets).reshape(-1)
    onehot = jax.nn.one_hot(tgt, C, dtype=jnp.float32)
    log_p = jnp.sum(x * onehot, axis=1, keepdims=True)
    probs = jnp.exp(log_p)
    a = jnp.asarray(alpha).reshape(-1)[tgt].reshape(-1, 1).astype(jnp.float32)
    batch_loss = -a * _focal_pow(1.0 - probs, gamma) * log_p
    return jnp.mean(batch_loss) if size_average else jnp.sum(batch_loss)


if __name__ == "__main__":
    key = jax.random.PRNGKey(0)
    k1, k2, k3, k4, k5, k6, k7 = jax.random.split(key, 7)

    # Test 1: module defaults (alpha = ones, gamma=5, mean). batch=8, class_num=32.
    N, C = 8, 32
    inputs = jax.random.normal(k1, (N, C), dtype=jnp.float32)
    targets = jax.random.randint(k2, (N,), 0, C, dtype=jnp.int32)
    alpha = jnp.ones((C,), dtype=jnp.float32)
    out = jax.block_until_ready(
        focal_loss(inputs, targets, alpha, gamma=5.0, size_average=True))
    ref = focal_loss_ref(inputs, targets, alpha, gamma=5.0, size_average=True)
    assert jnp.allclose(out, ref, rtol=1e-4, atol=1e-5), (out, ref)

    # Test 2: multi-tile grid with ragged last block, non-uniform alpha, sum.
    N2, C2 = 40, 32
    x2 = jax.random.normal(k3, (N2, C2), dtype=jnp.float32)
    t2 = jax.random.randint(k4, (N2,), 0, C2, dtype=jnp.int32)
    a2 = jax.random.uniform(k5, (C2,), minval=0.1, maxval=1.0, dtype=jnp.float32)
    out2 = jax.block_until_ready(
        focal_loss(x2, t2, a2, gamma=2.0, size_average=False, tile_n=16))
    ref2 = focal_loss_ref(x2, t2, a2, gamma=2.0, size_average=False)
    assert jnp.allclose(out2, ref2, rtol=1e-4, atol=1e-3), (out2, ref2)

    # Test 3: native bf16 logits DMA'd without a wrapper-side f32 cast.
    N3, C3 = 24, 48
    x3 = jax.random.normal(k6, (N3, C3), dtype=jnp.float32).astype(jnp.bfloat16)
    t3 = jax.random.randint(k7, (N3,), 0, C3, dtype=jnp.int32)
    a3 = jnp.ones((C3,), dtype=jnp.float32)
    out3 = jax.block_until_ready(
        focal_loss(x3, t3, a3, gamma=5.0, size_average=True, tile_n=16))
    ref3 = focal_loss_ref(x3, t3, a3, gamma=5.0, size_average=True)
    assert jnp.allclose(out3, ref3, rtol=1e-3, atol=1e-4), (out3, ref3)

    print("KERNEL_OK")
</pallas_src>

<mosaic_0001>
module attributes {stable_mosaic.version = 11 : i64} {
  func.func @_focal_loss_kernel(%arg0: i32, %arg1: memref<8x32xf32, #tpu.memory_space<vmem>>, %arg2: memref<8x1xi32, #tpu.memory_space<vmem>>, %arg3: memref<1x32xf32, #tpu.memory_space<vmem>>, %arg4: memref<8x1xf32, #tpu.memory_space<vmem>>) attributes {dimension_semantics = [#tpu.dimension_semantics<parallel>], iteration_bounds = array<i64: 1>, scalar_prefetch = 0 : i64, scratch_operands = 0 : i64, tpu.core_type = #tpu.core_type<tc>, window_params = [{transform_indices = @transform_0, window_bounds = array<i64: 8, 32>}, {transform_indices = @transform_1, window_bounds = array<i64: 8, 1>}, {pipeline_mode = #tpu.pipeline_mode<synchronous>, transform_indices = @transform_2, window_bounds = array<i64: 1, 32>}, {transform_indices = @transform_3, window_bounds = array<i64: 8, 1>}]} {
    %c0 = arith.constant 0 : index
    %c0_0 = arith.constant 0 : index
    %0 = vector.load %arg1[%c0, %c0_0] : memref<8x32xf32, #tpu.memory_space<vmem>>, vector<8x32xf32>
    %c0_1 = arith.constant 0 : index
    %c0_2 = arith.constant 0 : index
    %1 = vector.load %arg2[%c0_1, %c0_2] : memref<8x1xi32, #tpu.memory_space<vmem>>, vector<8x1xi32>
    %c0_3 = arith.constant 0 : index
    %c0_4 = arith.constant 0 : index
    %2 = vector.load %arg3[%c0_3, %c0_4] : memref<1x32xf32, #tpu.memory_space<vmem>>, vector<1x32xf32>
    %3 = tpu.iota {dimensions = array<i32: 1>} : vector<8x32xi32>
    %4 = vector.broadcast %1 : vector<8x1xi32> to vector<8x32xi32>
    %5 = arith.cmpi eq, %3, %4 : vector<8x32xi32>
    %cst = arith.constant 0.000000e+00 : f32
    %6 = vector.broadcast %cst : f32 to vector<8x32xf32>
    %7 = arith.select %5, %0, %6 : vector<8x32xi1>, vector<8x32xf32>
    %cst_5 = arith.constant 1.000000e+00 : f32
    %8 = vector.broadcast %cst_5 : f32 to vector<32x1xf32>
    %cst_6 = arith.constant dense<0.000000e+00> : vector<8x1xf32>
    %9 = tpu.matmul %7, %8, %cst_6 {dimension_numbers = #tpu.dot_dimension_numbers<[1], [0], [0], [1], [0, 0, 1, 1], [], []>, precision = #tpu.contract_precision<fp32>} : vector<8x32xf32>, vector<32x1xf32>, vector<8x1xf32> -> vector<8x1xf32>
    %cst_7 = arith.constant 0.000000e+00 : f32
    %10 = vector.shape_cast %2 : vector<1x32xf32> to vector<1x32xf32>
    %11 = vector.broadcast %10 : vector<1x32xf32> to vector<8x32xf32>
    %12 = vector.broadcast %cst_7 : f32 to vector<8x32xf32>
    %13 = arith.select %5, %11, %12 : vector<8x32xi1>, vector<8x32xf32>
    %cst_8 = arith.constant dense<0.000000e+00> : vector<8xf32>
    %14 = vector.multi_reduction <add>, %13, %cst_8 [1] : vector<8x32xf32> to vector<8xf32>
    %15 = vector.shape_cast %14 : vector<8xf32> to vector<8x1xf32>
    %16 = math.exp %9 : vector<8x1xf32>
    %cst_9 = arith.constant 1.000000e+00 : f32
    %17 = vector.broadcast %cst_9 : f32 to vector<8x1xf32>
    %18 = arith.subf %17, %16 : vector<8x1xf32>
    %19 = arith.mulf %18, %18 : vector<8x1xf32>
    %20 = arith.mulf %19, %19 : vector<8x1xf32>
    %21 = arith.mulf %18, %20 : vector<8x1xf32>
    %cst_10 = arith.constant 0.000000e+00 : f32
    %22 = vector.broadcast %cst_10 : f32 to vector<8x1xf32>
    %23 = arith.subf %22, %15 : vector<8x1xf32>
    %24 = arith.mulf %23, %21 : vector<8x1xf32>
    %25 = arith.mulf %24, %9 : vector<8x1xf32>
    %26 = tpu.iota {dimensions = array<i32: 0>} : vector<8x1xi32>
    %c8_i32 = arith.constant 8 : i32
    %27 = arith.muli %arg0, %c8_i32 : i32
    %28 = vector.broadcast %27 : i32 to vector<8x1xi32>
    %29 = arith.addi %26, %28 : vector<8x1xi32>
    %c8_i32_11 = arith.constant 8 : i32
    %30 = vector.broadcast %c8_i32_11 : i32 to vector<8x1xi32>
    %31 = arith.cmpi slt, %29, %30 : vector<8x1xi32>
    %cst_12 = arith.constant 0.000000e+00 : f32
    %32 = vector.broadcast %cst_12 : f32 to vector<8x1xf32>
    %33 = arith.select %31, %25, %32 : vector<8x1xi1>, vector<8x1xf32>
    %c0_13 = arith.constant 0 : index
    %c0_14 = arith.constant 0 : index
    %34 = vector.load %arg4[%c0_13, %c0_14] : memref<8x1xf32, #tpu.memory_space<vmem>>, vector<8x1xf32>
    tpu.vector_store %arg4[%c0_13, %c0_14], %33 {strides = array<i32>} : memref<8x1xf32, #tpu.memory_space<vmem>>, vector<8x1xf32>,
    return
  }
  func.func @transform_0(%arg0: i32) -> (i32, i32) {
    %c0_i32 = arith.constant 0 : i32
    %c0_i32_0 = arith.constant 0 : i32
    return %arg0, %c0_i32 : i32, i32
  }
  func.func @transform_1(%arg0: i32) -> (i32, i32) {
    %c0_i32 = arith.constant 0 : i32
    %c0_i32_0 = arith.constant 0 : i32
    return %arg0, %c0_i32 : i32, i32
  }
  func.func @transform_2(%arg0: i32) -> (i32, i32) {
    %c0_i32 = arith.constant 0 : i32
    %c0_i32_0 = arith.constant 0 : i32
    %c0_i32_1 = arith.constant 0 : i32
    return %c0_i32, %c0_i32_0 : i32, i32
  }
  func.func @transform_3(%arg0: i32) -> (i32, i32) {
    %c0_i32 = arith.constant 0 : i32
    %c0_i32_0 = arith.constant 0 : i32
    return %arg0, %c0_i32 : i32, i32
  }
}

</mosaic_0001>

<bundles_post_ra>
// kernel: tpu_custom_call.1
= control target key start
LH: loop header
LB: loop body
LE: loop exit
PB: predicated region body
PF: predicated region fallthrough
CT: control target
= control target key end

     0   :  { %v570_v0 = vmov 0   ;;  %v571_v2 = vmov 0.0   ;;  %vm572_vm0 = vmmov 0   ;;  %v573_v3 = vmov 1.0   ;;  %s612_s1 = inlined_call_operand.vmem [shape: s32[8,1], index: 1, kind: input, shape index: {}]   ;;  %s613_s0 = inlined_call_operand.vmem [shape: f32[8,32], index: 0, kind: input, shape index: {}]   ;;  %s614_s2 = inlined_call_operand.vmem [shape: f32[1,32], index: 2, kind: input, shape index: {}]   ;;  %s615_s3 = inlined_call_operand.vmem [shape: f32[8,1], index: 3, kind: output, shape index: {}]  }
   0x1   :  { %567 = vset.pattern.permute.xlu0 %v570_v0  ;;  %v15_v1 = vld [vmem:[%s612_s1] sm:$0xff]  ;;  %526 = vmatprep.subr.mxu1 %v571_v2  ;;  %v17_v4 = vlaneseq  ;;  %vm24_vm1 = vcmask 261120   ;;  %vm487_vm3 = vcmask 7168  }
   0x2   :  { %20 = vperm.xlu0 %567, %v15_v1   ;;  %515 = vmatprep.subr.mxu0 %v571_v2  ;;  %v14_v6 = vld [vmem:[%s613_s0] sm:$0xff] }
   0x3   :  { %527 = vmatpush3.msra.mxu1 %v571_v2  ;;  %528 = vmatprep.mubr.msk.f32.mxu1 %vm572_vm0, %v571_v2  ;;  %v18_v5 = vand.u32 127, %v17_v4  ;;  %v493_v7 = vld [vmem:[%s614_s2] ss:$0 sm:$0xff] }
   0x4   :  { %516 = vmatpush3.msra.mxu0 %v573_v3  ;;  %531 = vmatprep.subr.mxu1 %v571_v2 }
   0x5   :  { %517 = vmatprep.subr.mxu0 %v571_v2  ;;  %523 = vmatprep.mubr.msk.f32.mxu0 %vm572_vm0, %v571_v2 }
   0x6   :  { %518 = vmatpush3.msra.mxu0 %v573_v3 }
   0x7   :  { %519 = vmatprep.subr.mxu0 %v571_v2 }
   0x8   :  { %520 = vmatpush3.msra.mxu0 %v573_v3 }
   0x9   :  { %521 = vmatprep.subr.mxu0 %v571_v2 }
   0xa   :  { %522 = vmatpush3.msra.mxu0 %v573_v3 }
   0xb   :  { %552 = vmatprep.subr.mxu0 %v571_v2 }
  0x7d   :  { %v21_v8 = vpop.permute.xlu0 %20 }
  0x7e   :  { %vm22_vm2 = vcmp.eq.s32.totalorder %v18_v5, %v21_v8 }
  0x7f   :  { %v23_v9 = vsel %vm22_vm2, %v14_v6, 0.0  ;;  %v467_v10 = vsel %vm22_vm2, %v493_v7, 0.0 }
  0x80   :  { %v468_v11 = vsel %vm24_vm1, %v467_v10, 0.0  ;;  %v26_v12 = vsel %vm24_vm1, %v23_v9, 0 }
  0x81   :  { %469 = vadd.xlane.f32.xlu0 %v468_v11  ;;  %v93_v13 = vand.u32 4294901760, %v26_v12 }
  0x83   :  { %v94_v14 = vsub.f32 %v26_v12, %v93_v13  ;;  %529 = vmatmul.mubr.f32.vlgmr.msra.gmra.mxu1 %v93_v13 }
  0x84   :  { %532 = vmatpush3.msra.mxu1 %v571_v2  ;;  %533 = vmatprep.mubr.msk.f32.mxu1 %vm572_vm0, %v571_v2 }
  0x85   :  { %536 = vmatprep.subr.mxu1 %v571_v2  ;;  %v95_v15 = vand.u32 4294901760, %v94_v14 }
  0x87   :  { %534 = vmatmul.mubr.f32.vlgmr.msra.gmra.mxu1 %v94_v14  ;;  %v96_v16 = vsub.f32 %v94_v14, %v95_v15 }
  0x88   :  { %537 = vmatpush3.msra.mxu1 %v573_v3  ;;  %544 = vmatprep.mubr.msk.f32.mxu1 %vm572_vm0, %v571_v2 }
  0x89   :  { %538 = vmatprep.subr.mxu1 %v571_v2  ;;  %v97_v17 = vand.u32 4294901760, %v96_v16 }
  0x8a   :  { %539 = vmatpush3.msra.mxu1 %v573_v3 }
  0x8b   :  { %540 = vmatprep.subr.mxu1 %v571_v2  ;;  %524 = vmatmul.mubr.f32.vlgmr.msra.gmra.mxu0 %v97_v17 }
  0x8c   :  { %541 = vmatpush3.msra.mxu1 %v573_v3  ;;  %553 = vmatpush3.msra.mxu0 %v573_v3 }
  0x8d   :  { %542 = vmatprep.subr.mxu1 %v571_v2  ;;  %554 = vmatprep.subr.mxu0 %v571_v2 }
  0x8e   :  { %543 = vmatpush3.msra.mxu1 %v573_v3  ;;  %555 = vmatpush3.msra.mxu0 %v573_v3 }
  0x8f   :  { %545 = vmatmul.mubr.f32.vlgmr.msra.gmra.mxu1 %v95_v15  ;;  %547 = vmatprep.subr.mxu1 %v571_v2 }
  0x90   :  { %556 = vmatprep.subr.mxu0 %v571_v2  ;;  %548 = vmatpush3.msra.mxu1 %v571_v2 }
  0x91   :  { %557 = vmatpush3.msra.mxu0 %v573_v3  ;;  %549 = vmatprep.mubr.msk.f32.mxu1 %vm572_vm0, %v571_v2 }
  0x92   :  { %558 = vmatprep.subr.mxu0 %v571_v2  ;;  %560 = vmatprep.mubr.msk.f32.mxu0 %vm572_vm0, %v571_v2 }
  0x93   :  { %559 = vmatpush3.msra.mxu0 %v573_v3  ;;  %550 = vmatmul.mubr.f32.vlgmr.msra.gmra.mxu1 %v93_v13 }
  0x94   :  { %561 = vmatmul.mubr.f32.vlgmr.msra.gmra.mxu0 %v93_v13 }
 0x10a   :  { %v470_v39 = vpop.xlane.xlu0 %469 }
 0x10b   :  { %v477_v41 = vsub.f32 0.0, %v470_v39 }
 0x143   :  { %v170_v18 = vpop.f32.mrf.mxu1 }
 0x145   :  { %v530_v19 = vpop.f32.mrf.mxu1 }
 0x147   :  { %v242_v20 = vpop.f32.mrf.mxu1 }
 0x149   :  { %v535_v21 = vpop.f32.mrf.mxu1 }
 0x14b   :  { %v99_v22 = vpop.f32.mrf.mxu0 }
 0x14c   :  { %v171_v23 = vadd.f32 %v170_v18, %v99_v22 }
 0x14d   :  { %v525_v24 = vpop.f32.mrf.mxu0 }
 0x14e   :  { %v243_v25 = vadd.f32 %v242_v20, %v171_v23 }
 0x14f   :  { %v315_v26 = vpop.f32.mrf.mxu1 }
 0x150   :  { %v316_v27 = vadd.f32 %v315_v26, %v243_v25 }
 0x151   :  { %v546_v28 = vpop.f32.mrf.mxu1 }
 0x153   :  { %v386_v29 = vpop.f32.mrf.mxu1 }
 0x154   :  { %v387_v30 = vadd.f32 %v386_v29, %v316_v27  ;;  %v457_v31 = vpop.f32.mrf.mxu0 }
 0x155   :  { %v551_v32 = vpop.f32.mrf.mxu1 }
 0x156   :  { %v458_v33 = vadd.f32 %v457_v31, %v387_v30  ;;  %v562_v34 = vpop.f32.mrf.mxu0 }
 0x158   :  { %v471_v35 = vmul.f32 1.442695, %v458_v33 }
 0x15a   :  { %568 = vpow2.f32 %v471_v35 }
 0x167   :  { %v569_v36 = vpop.eup %568 }
 0x168   :  { %v473_v37 = vsub.f32 1.0, %v569_v36 }
 0x16a   :  { %v474_v38 = vmul.f32 %v473_v37, %v473_v37 }
 0x16c   :  { %v475_v40 = vmul.f32 %v474_v38, %v474_v38 }
 0x16e   :  { %v476_v42 = vmul.f32 %v475_v40, %v473_v37 }
 0x170   :  { %v478_v43 = vmul.f32 %v477_v41, %v476_v42 }
 0x172   :  { %v479_v44 = vmul.f32 %v478_v43, %v458_v33 }
 0x174   :  { %488 = vst.msk [vmem:[%s615_s3] sm:$0xff] %vm487_vm3, %v479_v44 }

</bundles_post_ra>
